<compile_context>
chip_gen: v7x
topology: tpu7x:2x2x1
jax: 0.10.0
libtpu: 0.0.40
codegen_flags: <defaults>
</compile_context>

<pallas_src>
import jax
import jax.numpy as jnp
from jax.experimental import pallas as pl
from jax.experimental.pallas import tpu as pltpu


def aflayer_kernel(x_ref, w1_rest_ref, snr_w1_ref, w2t_ref, o_ref):
    x = x_ref[...]                                            # (bb, C, HW), io dtype
    hw = x.shape[-1]

    # AdaptiveAvgPool2d(1): per-channel mean over spatial (f32 accumulate).
    y = jnp.sum(x.astype(jnp.float32), axis=-1) * (1.0 / hw)             # (bb, C)

    # fc1 (no bias): cat([snr, y], 1) @ W1.T == y @ W1[:, 1:].T + snr * W1[:, 0]
    # Tiny matvec -> VPU mul + lane reduce over C (don't pad the MXU).
    h = jnp.sum(y[:, None, :] * w1_rest_ref[...][None, :, :], axis=-1)   # (bb, hidden)
    h = h + snr_w1_ref[...]                                   # (1, hidden): snr pre-folded
    h = jnp.maximum(h, 0.0)                                   # ReLU

    # fc2 (no bias) + Sigmoid: z = sigmoid(h @ W2.T); W2.T supplied as (hidden, C).
    z = jnp.sum(h[:, :, None] * w2t_ref[...][None, :, :], axis=1)        # (bb, C)
    z = jax.nn.sigmoid(z)

    # Channel-wise rescale of the input; elementwise store in the io dtype.
    o_ref[...] = (x * z[:, :, None].astype(x.dtype)).astype(o_ref.dtype)


def _pick_batch_block(b, per_batch_bytes,
                      max_block_bytes=6 << 20, min_split_bytes=512 << 10):
    """Largest batch-chunk bb dividing b that fits the per-buffer VMEM budget.
    If the whole batch fits but two half-batch slabs are still large, split in
    two so v7x's dual TensorCores both get a grid step."""
    bb = b
    while bb > 1 and (b % bb != 0 or bb * per_batch_bytes > max_block_bytes):
        bb -= 1
    if bb == b and b % 2 == 0 and (b // 2) * per_batch_bytes >= min_split_bytes:
        bb = b // 2
    return bb


def aflayer_forward(x, snr, w1, w2):
    """x: (B, C, H, W); snr: python float; w1: (C//r, C+1); w2: (C, C//r)."""
    b, c, h, w = x.shape
    hidden = w1.shape[0]
    hw = h * w
    io_dtype = x.dtype
    x_flat = x.reshape(b, c, hw)                              # contiguous -> free reshape

    # Split W1 into its SNR column (pre-scaled by snr; identical for every batch
    # row, so folding it is exact) and the part acting on pooled features.
    w1f = w1.astype(jnp.float32)
    w1_rest = w1f[:, 1:]                                      # (hidden, C)
    snr_w1 = (jnp.float32(snr) * w1f[:, 0]).reshape(1, hidden)
    w2t = w2.astype(jnp.float32).T                            # (hidden, C)

    per_batch_bytes = c * hw * jnp.dtype(io_dtype).itemsize
    bb = _pick_batch_block(b, per_batch_bytes)
    nb = b // bb

    out = pl.pallas_call(
        aflayer_kernel,
        out_shape=jax.ShapeDtypeStruct((b, c, hw), io_dtype),
        grid=(nb,),
        in_specs=[
            pl.BlockSpec((bb, c, hw), lambda i: (i, 0, 0)),   # x batch chunk
            pl.BlockSpec((hidden, c), lambda i: (0, 0)),      # W1[:, 1:]
            pl.BlockSpec((1, hidden), lambda i: (0, 0)),      # snr * W1[:, 0]
            pl.BlockSpec((hidden, c), lambda i: (0, 0)),      # W2.T
        ],
        out_specs=pl.BlockSpec((bb, c, hw), lambda i: (i, 0, 0)),
        compiler_params=pltpu.CompilerParams(
            dimension_semantics=("parallel",),
            vmem_limit_bytes=32 << 20,
        ),
    )(x_flat, w1_rest, snr_w1, w2t)
    return out.reshape(b, c, h, w)


def aflayer_reference(x, snr, w1, w2):
    b = x.shape[0]
    y = x.mean(axis=(2, 3))                                   # (B, C)
    y = jnp.concatenate([jnp.full((b, 1), snr, x.dtype), y], axis=1)
    y = jnp.maximum(y @ w1.T, 0.0)
    y = jax.nn.sigmoid(y @ w2.T)                              # (B, C)
    return x * y[:, :, None, None]


if __name__ == "__main__":
    # Shapes consistent with AFlayer(channel=32, reduction=16).
    # H=W=16 -> HW=256 (multiple of 128) for lane-dense output stores.
    B, C, H, W = 2, 32, 16, 16
    REDUCTION = 16
    HIDDEN = C // REDUCTION
    SNR = 5.0

    key = jax.random.PRNGKey(0)
    kx, k1, k2 = jax.random.split(key, 3)
    x = jax.random.normal(kx, (B, C, H, W), dtype=jnp.float32)
    # Deterministic synthetic weights, torch nn.Linear convention (out, in).
    w1 = jax.random.normal(k1, (HIDDEN, C + 1), dtype=jnp.float32) * 0.1
    w2 = jax.random.normal(k2, (C, HIDDEN), dtype=jnp.float32) * 0.1

    out = aflayer_forward(x, SNR, w1, w2)
    out = jax.block_until_ready(out)

    ref = aflayer_reference(x, SNR, w1, w2)
    assert out.shape == (B, C, H, W)
    assert jnp.allclose(out, ref, atol=1e-5, rtol=1e-5), "mismatch vs reference"

    print("KERNEL_OK")
</pallas_src>

<mosaic_0001>
module attributes {stable_mosaic.version = 11 : i64} {
  func.func @aflayer_kernel(%arg0: i32, %arg1: memref<2x32x256xf32, #tpu.memory_space<vmem>>, %arg2: memref<2x32xf32, #tpu.memory_space<vmem>>, %arg3: memref<1x2xf32, #tpu.memory_space<vmem>>, %arg4: memref<2x32xf32, #tpu.memory_space<vmem>>, %arg5: memref<2x32x256xf32, #tpu.memory_space<vmem>>) attributes {dimension_semantics = [#tpu.dimension_semantics<parallel>], iteration_bounds = array<i64: 1>, scalar_prefetch = 0 : i64, scratch_operands = 0 : i64, tpu.core_type = #tpu.core_type<tc>, window_params = [{transform_indices = @transform_0, window_bounds = array<i64: 2, 32, 256>}, {pipeline_mode = #tpu.pipeline_mode<synchronous>, transform_indices = @transform_1, window_bounds = array<i64: 2, 32>}, {pipeline_mode = #tpu.pipeline_mode<synchronous>, transform_indices = @transform_2, window_bounds = array<i64: 1, 2>}, {pipeline_mode = #tpu.pipeline_mode<synchronous>, transform_indices = @transform_3, window_bounds = array<i64: 2, 32>}, {transform_indices = @transform_4, window_bounds = array<i64: 2, 32, 256>}]} {
    %c0 = arith.constant 0 : index
    %c0_0 = arith.constant 0 : index
    %c0_1 = arith.constant 0 : index
    %0 = vector.load %arg1[%c0, %c0_0, %c0_1] : memref<2x32x256xf32, #tpu.memory_space<vmem>>, vector<2x32x256xf32>
    %cst = arith.constant dense<0.000000e+00> : vector<2x32xf32>
    %1 = vector.multi_reduction <add>, %0, %cst [2] : vector<2x32x256xf32> to vector<2x32xf32>
    %cst_2 = arith.constant 3.906250e-03 : f32
    %2 = vector.broadcast %cst_2 : f32 to vector<2x32xf32>
    %3 = arith.mulf %1, %2 : vector<2x32xf32>
    %4 = vector.shape_cast %3 : vector<2x32xf32> to vector<2x1x32xf32>
    %c0_3 = arith.constant 0 : index
    %c0_4 = arith.constant 0 : index
    %5 = vector.load %arg2[%c0_3, %c0_4] : memref<2x32xf32, #tpu.memory_space<vmem>>, vector<2x32xf32>
    %6 = vector.shape_cast %5 : vector<2x32xf32> to vector<1x2x32xf32>
    %7 = vector.broadcast %4 : vector<2x1x32xf32> to vector<2x2x32xf32>
    %8 = vector.broadcast %6 : vector<1x2x32xf32> to vector<2x2x32xf32>
    %9 = arith.mulf %7, %8 : vector<2x2x32xf32>
    %cst_5 = arith.constant dense<0.000000e+00> : vector<2x2xf32>
    %10 = vector.multi_reduction <add>, %9, %cst_5 [2] : vector<2x2x32xf32> to vector<2x2xf32>
    %c0_6 = arith.constant 0 : index
    %c0_7 = arith.constant 0 : index
    %11 = vector.load %arg3[%c0_6, %c0_7] : memref<1x2xf32, #tpu.memory_space<vmem>>, vector<1x2xf32>
    %12 = vector.broadcast %11 : vector<1x2xf32> to vector<2x2xf32>
    %13 = arith.addf %10, %12 : vector<2x2xf32>
    %cst_8 = arith.constant 0.000000e+00 : f32
    %14 = vector.broadcast %cst_8 : f32 to vector<2x2xf32>
    %15 = arith.maximumf %13, %14 : vector<2x2xf32>
    %16 = vector.shape_cast %15 : vector<2x2xf32> to vector<2x2x1xf32>
    %c0_9 = arith.constant 0 : index
    %c0_10 = arith.constant 0 : index
    %17 = vector.load %arg4[%c0_9, %c0_10] : memref<2x32xf32, #tpu.memory_space<vmem>>, vector<2x32xf32>
    %18 = vector.shape_cast %17 : vector<2x32xf32> to vector<1x2x32xf32>
    %19 = vector.broadcast %16 : vector<2x2x1xf32> to vector<2x2x32xf32>
    %20 = vector.broadcast %18 : vector<1x2x32xf32> to vector<2x2x32xf32>
    %21 = arith.mulf %19, %20 : vector<2x2x32xf32>
    %cst_11 = arith.constant dense<0.000000e+00> : vector<2x32xf32>
    %22 = vector.multi_reduction <add>, %21, %cst_11 [1] : vector<2x2x32xf32> to vector<2x32xf32>
    %23 = arith.negf %22 : vector<2x32xf32>
    %24 = math.exp %23 : vector<2x32xf32>
    %cst_12 = arith.constant 1.000000e+00 : f32
    %25 = vector.broadcast %cst_12 : f32 to vector<2x32xf32>
    %26 = arith.addf %25, %24 : vector<2x32xf32>
    %27 = arith.divf %25, %26 : vector<2x32xf32>
    %28 = vector.shape_cast %27 : vector<2x32xf32> to vector<2x32x1xf32>
    %29 = vector.broadcast %28 : vector<2x32x1xf32> to vector<2x32x256xf32>
    %30 = arith.mulf %0, %29 : vector<2x32x256xf32>
    %c0_13 = arith.constant 0 : index
    %c0_14 = arith.constant 0 : index
    %c0_15 = arith.constant 0 : index
    %31 = vector.load %arg5[%c0_13, %c0_14, %c0_15] : memref<2x32x256xf32, #tpu.memory_space<vmem>>, vector<2x32x256xf32>
    tpu.vector_store %arg5[%c0_13, %c0_14, %c0_15], %30 {strides = array<i32>} : memref<2x32x256xf32, #tpu.memory_space<vmem>>, vector<2x32x256xf32>,
    return
  }
  func.func @transform_0(%arg0: i32) -> (i32, i32, i32) {
    %c0_i32 = arith.constant 0 : i32
    %c0_i32_0 = arith.constant 0 : i32
    %c0_i32_1 = arith.constant 0 : i32
    return %arg0, %c0_i32, %c0_i32_0 : i32, i32, i32
  }
  func.func @transform_1(%arg0: i32) -> (i32, i32) {
    %c0_i32 = arith.constant 0 : i32
    %c0_i32_0 = arith.constant 0 : i32
    %c0_i32_1 = arith.constant 0 : i32
    return %c0_i32, %c0_i32_0 : i32, i32
  }
  func.func @transform_2(%arg0: i32) -> (i32, i32) {
    %c0_i32 = arith.constant 0 : i32
    %c0_i32_0 = arith.constant 0 : i32
    %c0_i32_1 = arith.constant 0 : i32
    return %c0_i32, %c0_i32_0 : i32, i32
  }
  func.func @transform_3(%arg0: i32) -> (i32, i32) {
    %c0_i32 = arith.constant 0 : i32
    %c0_i32_0 = arith.constant 0 : i32
    %c0_i32_1 = arith.constant 0 : i32
    return %c0_i32, %c0_i32_0 : i32, i32
  }
  func.func @transform_4(%arg0: i32) -> (i32, i32, i32) {
    %c0_i32 = arith.constant 0 : i32
    %c0_i32_0 = arith.constant 0 : i32
    %c0_i32_1 = arith.constant 0 : i32
    return %arg0, %c0_i32, %c0_i32_0 : i32, i32, i32
  }
}

</mosaic_0001>

<bundles_post_ra>
// kernel: tpu_custom_call.1
= control target key start
LH: loop header
LB: loop body
LE: loop exit
PB: predicated region body
PF: predicated region fallthrough
CT: control target
= control target key end

     0   :  { %9 = vsyncpa [#allocation3], 0  ;;  %s663_s0 = inlined_call_operand.hbm [shape: f32[2,32,256], index: 0, kind: input, shape index: {}]   ;;  %s664_s1 = inlined_call_operand.vmem [shape: f32[2,32], index: 1, kind: input, shape index: {}]   ;;  %s665_s2 = inlined_call_operand.vmem [shape: f32[1,2], index: 2, kind: input, shape index: {}]   ;;  %s666_s3 = inlined_call_operand.vmem [shape: f32[2,32], index: 3, kind: input, shape index: {}]   ;;  %s667_s4 = inlined_call_operand.hbm [shape: f32[2,32,256], index: 4, kind: output, shape index: {}]  }
   0x1   :  { %10 = vsyncpa [#allocation4], 0  ;;  %s502_s15 = smov [#allocation2]   ;;  %s454_s19 = scalar_lea.hbm %s663_s0, 2048 }
   0x2   :  { %s16_s16 = sshll.u32 %s502_s15, 4  ;;  %p455_p0 = scmp.ne.s32.totalorder %s663_s0, %s454_s19  ;;  %s17_s16 = int_to_ptr.vmem [resolvable:$true] %s16_s16 }
   0x3   :  { %p458_p1 = scmp.lt.u32.totalorder %s454_s19, %s663_s0 }
   0x5   :  { %p460_p2 = pnand %p458_p1, %p455_p0 }
   0x7   :  { %463 = shalt.err (!%p460_p2)
}
   0x8   :  { %s464_s24 = scalar_lea.vmem %s17_s16, 2048  ;;  %p469_p4 = scmp.lt.s32.totalorder %s17_s16, %s17_s16 }
   0x9   :  { %p465_p3 = scmp.ne.s32.totalorder %s17_s16, %s464_s24  ;;  %p470_p5 = scmp.lt.s32.totalorder %s464_s24, %s464_s24 }
   0xb   :  { %p471_p6 = por %p470_p5, %p469_p4 }
   0xd   :  { %p472_p7 = pnand %p471_p6, %p465_p3 }
   0xf   :  { %475 = shalt.err (!%p472_p7)
}
  0x10   :  { %s503_s25 = smov 256   ;;  %s504_s26 = smov 16  }
  0x11   :  { %22 = dma.hbm_to_vmem [thread:$0]  %s663_s0, 2048, %s17_s16, [#allocation3], %s503_s25, %s503_s25, %s504_s26  }
  0x12   :  { %498 = dma.done.wait [#allocation3], 2048  }
  0x13   :  { %499 = vsyncadd [#allocation3], 4294965248  ;;  %v547_v0 = vld [vmem:[#allocation2 + $0x40] sm:$0xff]  ;;  %v549_v1 = vld [vmem:[#allocation2 + $0x48] sm:$0xff]  ;;  %v82_v24 = vlaneseq  ;;  %v505_v31 = vmov 0   ;;  %vm219_vm0 = vcmask 130112  }
  0x14   :  { %v551_v2 = vld [vmem:[#allocation2] sm:$0xff]  ;;  %v60_v3 = vadd.f32 %v549_v1, %v547_v0  ;;  %v555_v4 = vld [vmem:[#allocation2 + $0x8] sm:$0xff]  ;;  %v557_v5 = vld [vmem:[#allocation2 + $0x50] sm:$0xff]  ;;  %445 = vset.pattern.permute.xlu1 %v505_v31  ;;  %444 = vset.pattern.permute.xlu0 %v505_v31  ;;  %vm226_vm1 = vcmask 195712   ;;  %vm233_vm2 = vcmask 261312   ;;  %vm292_vm3 = vcmask 1041409  }
  0x15   :  { %v559_v6 = vld [vmem:[#allocation2 + $0x58] sm:$0xff]  ;;  %v48_v7 = vadd.f32 %v555_v4, %v551_v2  ;;  %v563_v8 = vld [vmem:[#allocation2 + $0x10] sm:$0xff]  ;;  %v571_v12 = vld [vmem:[#allocation2 + $0x60] sm:$0xff]  ;;  %v596_v25 = vshrl.u32 %v82_v24, 7  ;;  %v209_v31 = vand.u32 127, %v82_v24  ;;  %vm297_vm4 = vcmask 254976  }
  0x16   :  { %v565_v9 = vld [vmem:[#allocation2 + $0x18] sm:$0xff]  ;;  %61 = vadd.xlane.f32.xlu1 %v60_v3  ;;  %v63_v10 = vadd.f32 %v559_v6, %v557_v5  ;;  %v573_v13 = vld [vmem:[#allocation2 + $0x68] sm:$0xff]  ;;  %v575_v14 = vld [vmem:[#allocation2 + $0x20] sm:$0xff] }
  0x17   :  { %49 = vadd.xlane.f32.xlu0 %v48_v7  ;;  %v51_v11 = vadd.f32 %v565_v9, %v563_v8  ;;  %v577_v15 = vld [vmem:[#allocation2 + $0x28] sm:$0xff]  ;;  %v66_v16 = vadd.f32 %v573_v13, %v571_v12  ;;  %v583_v18 = vld [vmem:[#allocation2 + $0x70] sm:$0xff]  ;;  %v585_v19 = vld [vmem:[#allocation2 + $0x78] sm:$0xff]  ;;  %v84_v26 = vsub.s32 0, %v596_v25  ;;  %v103_v29 = vsub.s32 1, %v596_v25 }
  0x18   :  { %v54_v17 = vadd.f32 %v577_v15, %v575_v14  ;;  %v587_v20 = vld [vmem:[#allocation2 + $0x30] sm:$0xff]  ;;  %v589_v21 = vld [vmem:[#allocation2 + $0x38] sm:$0xff]  ;;  %v69_v22 = vadd.f32 %v585_v19, %v583_v18  ;;  %v80_v27 = vld [vmem:[%s664_s1] sm:$0x3] }
  0x19   :  { %v57_v23 = vadd.f32 %v589_v21, %v587_v20  ;;  %v85_v28 = vrot.slane %v80_v27, %v84_v26  ;;  %v104_v30 = vrot.slane %v80_v27, %v103_v29 }
  0x1a   :  { %64 = vadd.xlane.f32.xlu1 %v63_v10 }
  0x1b   :  { %52 = vadd.xlane.f32.xlu0 %v51_v11 }
  0x1e   :  { %67 = vadd.xlane.f32.xlu1 %v66_v16 }
  0x1f   :  { %55 = vadd.xlane.f32.xlu0 %v54_v17 }
  0x22   :  { %70 = vadd.xlane.f32.xlu1 %v69_v22 }
  0x23   :  { %58 = vadd.xlane.f32.xlu0 %v57_v23 }
  0x33   :  { %91 = vbcast.lane.b32.xlu1 %v85_v28, 264 }
  0x37   :  { %106 = vbcast.lane.b32.xlu1 %v104_v30, 256 }
  0x39   :  { %87 = vbcast.lane.b32.xlu0 %v85_v28, 256 }
  0x3b   :  { %110 = vbcast.lane.b32.xlu1 %v104_v30, 264 }
  0x3d   :  { %95 = vbcast.lane.b32.xlu0 %v85_v28, 272 }
  0x3f   :  { %114 = vbcast.lane.b32.xlu1 %v104_v30, 272 }
  0x41   :  { %99 = vbcast.lane.b32.xlu0 %v85_v28, 280 }
  0x43   :  { %118 = vbcast.lane.b32.xlu1 %v104_v30, 280 }
  0xa3   :  { %v62_v32 = vpop.xlane.xlu1 %61 }
  0xa4   :  { %v50_v33 = vpop.xlane.xlu0 %49  ;;  %v76_v48 = vmul.f32 0.00390625, %v62_v32 }
  0xa5   :  { %v72_v41 = vmul.f32 0.00390625, %v50_v33 }
  0xa7   :  { %v65_v34 = vpop.xlane.xlu1 %64 }
  0xa8   :  { %v53_v35 = vpop.xlane.xlu0 %52  ;;  %v77_v52 = vmul.f32 0.00390625, %v65_v34  ;;  %v214_v34 = vadd.s32 4294967288, %v209_v31 }
  0xa9   :  { %v73_v40 = vmul.f32 0.00390625, %v53_v35 }
  0xab   :  { %v68_v36 = vpop.xlane.xlu1 %67 }
  0xac   :  { %v56_v37 = vpop.xlane.xlu0 %55  ;;  %v78_v60 = vmul.f32 0.00390625, %v68_v36 }
  0xad   :  { %v74_v56 = vmul.f32 0.00390625, %v56_v37  ;;  %v221_v37 = vadd.s32 4294967280, %v209_v31 }
  0xaf   :  { %v71_v38 = vpop.xlane.xlu1 %70 }
  0xb0   :  { %v59_v39 = vpop.xlane.xlu0 %58  ;;  %v79_v16 = vmul.f32 0.00390625, %v71_v38  ;;  %v228_v38 = vadd.s32 4294967272, %v209_v31 }
  0xb1   :  { %v75_v3 = vmul.f32 0.00390625, %v59_v39  ;;  %v217_v39 = vsub.s32 %v214_v34, %v596_v25  ;;  %v436_v34 = vld [vmem:[%s665_s2] ss:$0 sm:$0xff]  ;;  %s506_s2 = smov [#allocation5]  }
  0xb3   :  { %v92_v42 = vpop.permute.xlu1 %91 }
  0xb4   :  { %v129_v43 = vmul.f32 %v92_v42, %v73_v40  ;;  %v88_v44 = vpop.permute.xlu0 %87  ;;  %v137_v53 = vmul.f32 %v92_v42, %v77_v52 }
  0xb5   :  { %v128_v45 = vmul.f32 %v88_v44, %v72_v41  ;;  %v136_v50 = vmul.f32 %v88_v44, %v76_v48  ;;  %v231_v44 = vsub.s32 %v228_v38, %v596_v25 }
  0xb6   :  { %164 = vperm.xlu1 %445, %v129_v43   ;;  %v224_v43 = vsub.s32 %v221_v37, %v596_v25 }
  0xb7   :  { %161 = vperm.xlu0 %444, %v128_v45   ;;  %v107_v46 = vpop.permute.xlu1 %106 }
  0xb8   :  { %v132_v47 = vmul.f32 %v107_v46, %v72_v41  ;;  %v140_v54 = vmul.f32 %v107_v46, %v76_v48  ;;  %v96_v55 = vpop.permute.xlu0 %95 }
  0xb9   :  { %v130_v57 = vmul.f32 %v96_v55, %v74_v56  ;;  %v138_v61 = vmul.f32 %v96_v55, %v78_v60 }
  0xba   :  { %173 = vperm.xlu1 %445, %v132_v47  }
  0xbb   :  { %v111_v49 = vpop.permute.xlu1 %110 }
  0xbc   :  { %v133_v51 = vmul.f32 %v111_v49, %v73_v40  ;;  %v141_v58 = vmul.f32 %v111_v49, %v77_v52  ;;  %v100_v63 = vpop.permute.xlu0 %99  ;;  %v212_v40 = vsub.s32 %v209_v31, %v596_v25 }
  0xbd   :  { %v131_v7 = vmul.f32 %v100_v63, %v75_v3  ;;  %v139_v17 = vmul.f32 %v100_v63, %v79_v16 }
  0xbe   :  { %185 = vperm.xlu1 %445, %v136_v50   ;;  %176 = vperm.xlu0 %444, %v133_v51  }
  0xbf   :  { %v115_v59 = vpop.permute.xlu1 %114 }
  0xc0   :  { %v134_v62 = vmul.f32 %v115_v59, %v74_v56  ;;  %v142_v10 = vmul.f32 %v115_v59, %v78_v60 }
  0xc2   :  { %197 = vperm.xlu1 %445, %v140_v54   ;;  %188 = vperm.xlu0 %444, %v137_v53  }
  0xc3   :  { %v119_v11 = vpop.permute.xlu1 %118 }
  0xc4   :  { %v135_v22 = vmul.f32 %v119_v11, %v75_v3  ;;  %v143_v23 = vmul.f32 %v119_v11, %v79_v16 }
  0xc6   :  { %200 = vperm.xlu0 %444, %v141_v58   ;;  %167 = vperm.xlu1 %445, %v130_v57  }
  0xca   :  { %179 = vperm.xlu0 %444, %v134_v62   ;;  %191 = vperm.xlu1 %445, %v138_v61  }
  0xce   :  { %203 = vperm.xlu0 %444, %v142_v10   ;;  %170 = vperm.xlu1 %445, %v131_v7  }
  0xd2   :  { %182 = vperm.xlu0 %444, %v135_v22   ;;  %194 = vperm.xlu1 %445, %v139_v17  }
  0xd6   :  { %206 = vperm.xlu0 %444, %v143_v23  }
 0x135   :  { %v165_v26 = vpop.permute.xlu1 %164 }
 0x136   :  { %v162_v27 = vpop.permute.xlu0 %161  ;;  %v218_v45 = vrot.slane %v165_v26, %v217_v39 }
 0x137   :  { %v213_v46 = vrot.slane %v162_v27, %v212_v40 }
 0x139   :  { %v174_v28 = vpop.permute.xlu1 %173  ;;  %v220_v53 = vsel %vm219_vm0, %v218_v45, %v213_v46 }
 0x13a   :  { %v238_v51 = vrot.slane %v174_v28, %v212_v40 }
 0x13d   :  { %v186_v29 = vpop.permute.xlu1 %185  ;;  %v177_v30 = vpop.permute.xlu0 %176 }
 0x13e   :  { %v242_v48 = vrot.slane %v177_v30, %v217_v39  ;;  %v257_v54 = vrot.slane %v186_v29, %v212_v40 }
 0x140   :  { %v243_v25 = vsel %vm219_vm0, %v242_v48, %v238_v51 }
 0x141   :  { %v198_v32 = vpop.permute.xlu1 %197  ;;  %v189_v33 = vpop.permute.xlu0 %188 }
 0x142   :  { %v261_v57 = vrot.slane %v189_v33, %v217_v39  ;;  %v276_v3 = vrot.slane %v198_v32, %v212_v40 }
 0x144   :  { %v262_v22 = vsel %vm219_vm0, %v261_v57, %v257_v54 }
 0x145   :  { %v168_v35 = vpop.permute.xlu1 %167  ;;  %v201_v36 = vpop.permute.xlu0 %200 }
 0x146   :  { %v225_v49 = vrot.slane %v168_v35, %v224_v43  ;;  %v280_v58 = vrot.slane %v201_v36, %v217_v39 }
 0x148   :  { %v227_v60 = vsel %vm226_vm1, %v225_v49, %v220_v53  ;;  %v281_v23 = vsel %vm219_vm0, %v280_v58, %v276_v3 }
 0x149   :  { %v192_v41 = vpop.permute.xlu1 %191  ;;  %v180_v42 = vpop.permute.xlu0 %179 }
 0x14a   :  { %v247_v50 = vrot.slane %v180_v42, %v224_v43  ;;  %v266_v61 = vrot.slane %v192_v41, %v224_v43  ;;  %v318_v42 = vld [vmem:[%s666_s3] sm:$0x3]  ;;  %s424_s3 = sshll.u32 %s506_s2, 4  ;;  %s425_s3 = int_to_ptr.vmem [resolvable:$true] %s424_s3 }
 0x14b   :  { %s476_s7 = scalar_lea.vmem %s425_s3, 2048  ;;  %p481_p9 = scmp.lt.s32.totalorder %s425_s3, %s425_s3 }
 0x14c   :  { %v248_v62 = vsel %vm226_vm1, %v247_v50, %v243_v25  ;;  %v267_v28 = vsel %vm226_vm1, %v266_v61, %v262_v22  ;;  %p477_p8 = scmp.ne.s32.totalorder %s425_s3, %s476_s7  ;;  %p482_p10 = scmp.lt.s32.totalorder %s476_s7, %s476_s7 }
 0x14d   :  { %v171_v24 = vpop.permute.xlu1 %170  ;;  %v204_v47 = vpop.permute.xlu0 %203 }
 0x14e   :  { %v232_v52 = vrot.slane %v171_v24, %v231_v44  ;;  %v285_v63 = vrot.slane %v204_v47, %v224_v43  ;;  %p483_p11 = por %p482_p10, %p481_p9 }
 0x150   :  { %v234_v10 = vsel %vm233_vm2, %v232_v52, %v227_v60  ;;  %v286_v29 = vsel %vm226_vm1, %v285_v63, %v281_v23  ;;  %p484_p12 = pnand %p483_p11, %p477_p8 }
 0x151   :  { %v195_v55 = vpop.permute.xlu1 %194  ;;  %v183_v56 = vpop.permute.xlu0 %182 }
 0x152   :  { %v252_v59 = vrot.slane %v183_v56, %v231_v44  ;;  %v271_v7 = vrot.slane %v195_v55, %v231_v44 }
 0x154   :  { %v253_v11 = vsel %vm233_vm2, %v252_v59, %v248_v62  ;;  %v272_v30 = vsel %vm233_vm2, %v271_v7, %v267_v28 }
 0x155   :  { %v207_v16 = vpop.permute.xlu0 %206  ;;  %v293_v17 = vsel %vm292_vm3, %v253_v11, %v234_v10 }
 0x156   :  { %v290_v26 = vrot.slane %v207_v16, %v231_v44  ;;  %v298_v27 = vsel %vm297_vm4, %v293_v17, 0.0 }
 0x157   :  { %299 = vadd.xlane.f32.xlu1 %v298_v27 }
 0x158   :  { %v291_v31 = vsel %vm233_vm2, %v290_v26, %v286_v29 }
 0x159   :  { %v294_v32 = vsel %vm292_vm3, %v291_v31, %v272_v30 }
 0x15a   :  { %v301_v33 = vsel %vm297_vm4, %v294_v32, 0.0 }
 0x15b   :  { %302 = vadd.xlane.f32.xlu0 %v301_v33 }
 0x171   :  { %311 = vbcast.lane.b32.xlu0 %v436_v34, 256 }
 0x1e4   :  { %v300_v36 = vpop.xlane.xlu1 %299 }
 0x1e8   :  { %v303_v35 = vpop.xlane.xlu0 %302 }
 0x1ec   :  { %v312_v37 = vpop.permute.xlu0 %311 }
 0x1ed   :  { %v314_v38 = vadd.f32 %v312_v37, %v300_v36  ;;  %v315_v39 = vadd.f32 %v312_v37, %v303_v35 }
 0x1ef   :  { %v316_v40 = vmax.f32 %v314_v38, 0.0  ;;  %v317_v41 = vmax.f32 %v315_v39, 0.0 }
 0x1f1   :  { %321 = vperm.xlu1 %445, %v316_v40  }
 0x1f5   :  { %326 = vperm.xlu1 %445, %v317_v41  }
 0x270   :  { %v322_v43 = vpop.permute.xlu1 %321 }
 0x271   :  { %v329_v44 = vmul.f32 %v322_v43, %v318_v42 }
 0x273   :  { %v331_v45 = vsel %vm297_vm4, %v329_v44, 0.0 }
 0x274   :  { %v332_v46 = vrot.slane %v331_v45, 4  ;;  %v327_v24 = vpop.permute.xlu1 %326 }
 0x275   :  { %v330_v47 = vmul.f32 %v327_v24, %v318_v42 }
 0x276   :  { %v333_v48 = vadd.f32 %v332_v46, %v331_v45 }
 0x277   :  { %v338_v49 = vsel %vm297_vm4, %v330_v47, 0.0 }
 0x278   :  { %v334_v50 = vrot.slane %v333_v48, 2  ;;  %v339_v51 = vrot.slane %v338_v49, 4 }
 0x27a   :  { %v335_v52 = vadd.f32 %v334_v50, %v333_v48  ;;  %v340_v53 = vadd.f32 %v339_v51, %v338_v49 }
 0x27c   :  { %v336_v54 = vrot.slane %v335_v52, 1  ;;  %v341_v55 = vrot.slane %v340_v53, 2 }
 0x27e   :  { %v337_v56 = vadd.f32 %v336_v54, %v335_v52  ;;  %v342_v25 = vadd.f32 %v341_v55, %v340_v53 }
 0x280   :  { %v437_v57 = vmul.f32 -1.442695, %v337_v56  ;;  %v343_v58 = vrot.slane %v342_v25, 1 }
 0x282   :  { %446 = vpow2.f32 %v437_v57  ;;  %v344_v59 = vadd.f32 %v343_v58, %v342_v25 }
 0x284   :  { %v438_v60 = vmul.f32 -1.442695, %v344_v59 }
 0x286   :  { %448 = vpow2.f32 %v438_v60 }
 0x28c   :  { %v447_v61 = vpop.eup %446 }
 0x28d   :  { %v351_v62 = vadd.f32 1.0, %v447_v61 }
 0x28f   :  { %450 = vrcp.f32 %v351_v62 }
 0x290   :  { %v449_v63 = vpop.eup %448 }
 0x291   :  { %v352_v3 = vadd.f32 1.0, %v449_v63 }
 0x293   :  { %452 = vrcp.f32 %v352_v3 }
 0x299   :  { %v451_v7 = vpop.eup %450 }
 0x29a   :  { %362 = vbcast.lane.b32.xlu1 %v451_v7, 264  ;;  %358 = vbcast.lane.b32.xlu0 %v451_v7, 256 }
 0x29d   :  { %v453_v10 = vpop.eup %452 }
 0x29e   :  { %370 = vbcast.lane.b32.xlu1 %v451_v7, 280  ;;  %366 = vbcast.lane.b32.xlu0 %v451_v7, 272 }
 0x2a2   :  { %377 = vbcast.lane.b32.xlu1 %v453_v10, 264  ;;  %373 = vbcast.lane.b32.xlu0 %v453_v10, 256 }
 0x2a6   :  { %385 = vbcast.lane.b32.xlu1 %v453_v10, 280  ;;  %381 = vbcast.lane.b32.xlu0 %v453_v10, 272 }
 0x30c   :  { %v359_v11 = vpop.permute.xlu0 %358  ;;  %v363_v16 = vpop.permute.xlu1 %362 }
 0x30d   :  { %v387_v17 = vmul.f32 %v359_v11, %v551_v2  ;;  %v388_v22 = vmul.f32 %v359_v11, %v555_v4  ;;  %v389_v23 = vmul.f32 %v363_v16, %v563_v8  ;;  %v390_v26 = vmul.f32 %v363_v16, %v565_v9 }
 0x30f   :  { %403 = vst [vmem:[#allocation5] sm:$0xff] %v387_v17  ;;  %404 = vst [vmem:[#allocation5 + $0x8] sm:$0xff] %v388_v22 }
 0x310   :  { %405 = vst [vmem:[#allocation5 + $0x10] sm:$0xff] %v389_v23  ;;  %406 = vst [vmem:[#allocation5 + $0x18] sm:$0xff] %v390_v26  ;;  %v367_v27 = vpop.permute.xlu0 %366  ;;  %v371_v28 = vpop.permute.xlu1 %370 }
 0x311   :  { %v391_v29 = vmul.f32 %v367_v27, %v575_v14  ;;  %v392_v30 = vmul.f32 %v367_v27, %v577_v15  ;;  %v393_v31 = vmul.f32 %v371_v28, %v587_v20  ;;  %v394_v2 = vmul.f32 %v371_v28, %v589_v21 }
 0x313   :  { %407 = vst [vmem:[#allocation5 + $0x20] sm:$0xff] %v391_v29  ;;  %408 = vst [vmem:[#allocation5 + $0x28] sm:$0xff] %v392_v30 }
 0x314   :  { %409 = vst [vmem:[#allocation5 + $0x30] sm:$0xff] %v393_v31  ;;  %410 = vst [vmem:[#allocation5 + $0x38] sm:$0xff] %v394_v2  ;;  %v374_v4 = vpop.permute.xlu0 %373  ;;  %v378_v8 = vpop.permute.xlu1 %377 }
 0x315   :  { %v395_v9 = vmul.f32 %v374_v4, %v547_v0  ;;  %v396_v32 = vmul.f32 %v374_v4, %v549_v1  ;;  %v397_v33 = vmul.f32 %v378_v8, %v557_v5  ;;  %v398_v14 = vmul.f32 %v378_v8, %v559_v6 }
 0x317   :  { %411 = vst [vmem:[#allocation5 + $0x40] sm:$0xff] %v395_v9  ;;  %412 = vst [vmem:[#allocation5 + $0x48] sm:$0xff] %v396_v32 }
 0x318   :  { %413 = vst [vmem:[#allocation5 + $0x50] sm:$0xff] %v397_v33  ;;  %414 = vst [vmem:[#allocation5 + $0x58] sm:$0xff] %v398_v14  ;;  %v382_v15 = vpop.permute.xlu0 %381  ;;  %v386_v20 = vpop.permute.xlu1 %385 }
 0x319   :  { %v399_v21 = vmul.f32 %v382_v15, %v571_v12  ;;  %v400_v34 = vmul.f32 %v382_v15, %v573_v13  ;;  %v401_v0 = vmul.f32 %v386_v20, %v583_v18  ;;  %v402_v1 = vmul.f32 %v386_v20, %v585_v19 }
 0x31b   :  { %415 = vst [vmem:[#allocation5 + $0x60] sm:$0xff] %v399_v21  ;;  %416 = vst [vmem:[#allocation5 + $0x68] sm:$0xff] %v400_v34 }
 0x31c   :  { %417 = vst [vmem:[#allocation5 + $0x70] sm:$0xff] %v401_v0  ;;  %418 = vst [vmem:[#allocation5 + $0x78] sm:$0xff] %v402_v1 }
 0x31d   :  { %487 = shalt.err (!%p484_p12)
}
 0x31e   :  { %s488_s10 = scalar_lea.hbm %s667_s4, 2048 }
 0x31f   :  { %p489_p13 = scmp.ne.s32.totalorder %s667_s4, %s488_s10  ;;  %p492_p0 = scmp.lt.u32.totalorder %s488_s10, %s667_s4 }
 0x321   :  { %p494_p1 = pnand %p492_p0, %p489_p13 }
 0x323   :  { %497 = shalt.err (!%p494_p1)
}
 0x324   :  { %430 = dma.vmem_to_hbm [thread:$0]  %s425_s3, 2048, %s667_s4, [#allocation4], %s503_s25, %s503_s25, %s504_s26  }
 0x325   :  { %500 = dma.done.wait [#allocation4], 2048  }
 0x326   :  { %501 = vsyncadd [#allocation4], 4294965248 }
 0x327   :  { %434 = vsyncpa [#allocation3], 1 }
 0x328   :  { %435 = vsyncpa [#allocation4], 1 }

</bundles_post_ra>
